<compile_context>
chip_gen: v5e
topology: v5e:2x2
jax: 0.10.0
libtpu: 0.0.40
codegen_flags: <defaults>
</compile_context>

<pallas_src>
import jax
import jax.numpy as jnp
import numpy as np
from jax.experimental import pallas as pl
from jax.experimental.pallas import tpu as pltpu


def _round_up(x, m):
    return -(-x // m) * m


def _embed_kernel(idx_ref, e_ref, w_ref, out_ref):
    # idx_ref: (TILE_R, FOLD)    int32 -- FOLD tokens packed per row
    # e_ref:   (FOLD, FOLD*T)    f32   -- lane-expansion matrix, E[g, l] = (l // T == g)
    # w_ref:   (FOLD*T, FOLD*D)  f32   -- block-diag-of-table, W[g*T+t, g*D:(g+1)*D] = table[t]
    # out_ref: (TILE_R, FOLD*D)        -- lane-dense folded embeddings
    tile_r, fold = idx_ref.shape
    ft = e_ref.shape[1]
    t_num = ft // fold

    # MXU lane-expansion: idx_b[r, l] = idx[r, l // T]  (exact: small ints x 0/1).
    idx_f = idx_ref[...].astype(jnp.float32)
    idx_b = jnp.dot(
        idx_f,
        e_ref[...],
        precision=jax.lax.Precision.HIGHEST,
        preferred_element_type=jnp.float32,
    )

    # One VPU compare per lane builds the folded one-hot (0/1 in f32).
    t_pat = (
        jax.lax.broadcasted_iota(jnp.int32, (tile_r, ft), 1) % t_num
    ).astype(jnp.float32)
    onehot = (idx_b == t_pat).astype(jnp.float32)

    # MXU gather: out[r, g*D + j] = sum_t onehot[r, g*T + t] * table[t, j].
    out = jnp.dot(
        onehot,
        w_ref[...],
        precision=jax.lax.Precision.HIGHEST,
        preferred_element_type=jnp.float32,
    )
    out_ref[...] = out.astype(out_ref.dtype)


def condition_embedding(conditions, table, *, tile_rows=2048):
    """Pallas equivalent of ConditionEmbedding.forward(conditions).

    conditions: integer tensor of any shape.
    table:      (type_num, dim) embedding table (row 0 = padding row).
    """
    orig_shape = conditions.shape
    t_num, d = table.shape
    n = int(np.prod(orig_shape)) if orig_shape else 1

    # Fold as many tokens as fit into a 128-lane row (8 for dim=16).
    if d <= 128 and 128 % d == 0:
        fold = 128 // d
    else:
        fold = 1  # TODO(synk): pad dim up to a lane multiple for odd dims (masked stores).
    lanes = fold * d
    ft = fold * t_num

    # Rows of `fold` tokens; pad only to a sublane multiple of 8 (<= 63 extra
    # tokens), NOT to a whole tile -- avoids the large post-kernel de-pad copy.
    r = -(-n // fold)
    r8 = max(8, _round_up(r, 8))
    n_pad = r8 * fold

    idx_flat = conditions.reshape(-1).astype(jnp.int32)
    if n_pad != n:
        idx_flat = jnp.pad(idx_flat, (0, n_pad - n))  # pad with index 0 (padding row)
    idx_folded = idx_flat.reshape(r8, fold)

    # Resident constants (tiny, fetched once, stay in VMEM for the whole grid):
    #   E = kron(I_fold, ones(1, T))   -- lane-expansion selector
    #   W = kron(I_fold, table)        -- block-diagonal-of-table gather weights
    tf32 = table.astype(jnp.float32)
    eye_f = jnp.eye(fold, dtype=jnp.float32)
    e_mat = jnp.kron(eye_f, jnp.ones((1, t_num), jnp.float32))  # (fold, fold*T)
    w_mat = jnp.kron(eye_f, tf32)                               # (fold*T, fold*d)

    # Tile rows: large tiles amortize the ~0.35us/step overhead; keep >= 2 grid
    # programs when possible so v7x's two TensorCores both get work.
    tile_r = min(_round_up(int(tile_rows), 8), r8)
    if -(-r8 // tile_r) < 2 and r8 >= 16:
        tile_r = _round_up(-(-r8 // 2), 8)
    grid = (-(-r8 // tile_r),)  # ragged last block is masked by Pallas

    out_folded = pl.pallas_call(
        _embed_kernel,
        out_shape=jax.ShapeDtypeStruct((r8, lanes), table.dtype),
        grid_spec=pltpu.PrefetchScalarGridSpec(
            num_scalar_prefetch=0,
            grid=grid,
            in_specs=[
                pl.BlockSpec((tile_r, fold), lambda i: (i, 0)),
                pl.BlockSpec((fold, ft), lambda i: (0, 0)),     # resident E
                pl.BlockSpec((ft, lanes), lambda i: (0, 0)),    # resident W
            ],
            out_specs=pl.BlockSpec((tile_r, lanes), lambda i: (i, 0)),
        ),
        compiler_params=pltpu.CompilerParams(
            dimension_semantics=("parallel",),
        ),
    )(idx_folded, e_mat, w_mat)

    out_flat = out_folded.reshape(n_pad, d)
    if n_pad != n:
        out_flat = out_flat[:n]
    return out_flat.reshape(*orig_shape, d)


def init_condition_embedding_params(key, type_num=8, dim=16):
    """Init matching nn.Embedding(type_num, dim, padding_idx=0):
    weights ~ N(0, 1), row 0 (the padding index) zeroed."""
    w = jax.random.normal(key, (type_num, dim), dtype=jnp.float32)
    w = w.at[0].set(0.0)
    return w


if __name__ == "__main__":
    key = jax.random.PRNGKey(0)
    k_w, k_idx, k_idx2, k_idx3 = jax.random.split(key, 4)

    dim = 16
    type_num = 8
    batch, seq = 2, 8

    table = init_condition_embedding_params(k_w, type_num=type_num, dim=dim)

    # Small shape matching the module defaults (single tiny tile).
    conditions = jax.random.randint(
        k_idx, (batch, seq), minval=0, maxval=type_num, dtype=jnp.int32
    )
    out = condition_embedding(conditions, table)
    out = jax.block_until_ready(out)
    ref = jnp.take(table, conditions, axis=0)
    assert out.shape == (batch, seq, dim), out.shape
    np.testing.assert_allclose(np.asarray(out), np.asarray(ref), rtol=1e-6, atol=1e-6)

    # Shape exercising multiple grid tiles, a ragged last block, and tail trim.
    conditions2 = jax.random.randint(
        k_idx2, (4, 257), minval=0, maxval=type_num, dtype=jnp.int32
    )
    out2 = condition_embedding(conditions2, table, tile_rows=64)
    out2 = jax.block_until_ready(out2)
    ref2 = jnp.take(table, conditions2, axis=0)
    assert out2.shape == (4, 257, dim), out2.shape
    np.testing.assert_allclose(np.asarray(out2), np.asarray(ref2), rtol=1e-6, atol=1e-6)

    # Medium shape hitting the default large-tile, no-pad / no-slice fast path
    # (n divisible by 64 -> the auto >=2-tile split kicks in).
    conditions3 = jax.random.randint(
        k_idx3, (64, 512), minval=0, maxval=type_num, dtype=jnp.int32
    )
    out3 = condition_embedding(conditions3, table)
    out3 = jax.block_until_ready(out3)
    ref3 = jnp.take(table, conditions3, axis=0)
    assert out3.shape == (64, 512, dim), out3.shape
    np.testing.assert_allclose(np.asarray(out3), np.asarray(ref3), rtol=1e-6, atol=1e-6)

    print("KERNEL_OK")
</pallas_src>

<mosaic_0001>
module attributes {stable_mosaic.version = 11 : i64} {
  func.func @_embed_kernel(%arg0: i32, %arg1: memref<8x8xi32, #tpu.memory_space<vmem>>, %arg2: memref<8x64xf32, #tpu.memory_space<vmem>>, %arg3: memref<64x128xf32, #tpu.memory_space<vmem>>, %arg4: memref<8x128xf32, #tpu.memory_space<vmem>>) attributes {dimension_semantics = [#tpu.dimension_semantics<parallel>], iteration_bounds = array<i64: 1>, scalar_prefetch = 0 : i64, scratch_operands = 0 : i64, tpu.core_type = #tpu.core_type<tc>, window_params = [{transform_indices = @transform_0, window_bounds = array<i64: 8, 8>}, {pipeline_mode = #tpu.pipeline_mode<synchronous>, transform_indices = @transform_1, window_bounds = array<i64: 8, 64>}, {pipeline_mode = #tpu.pipeline_mode<synchronous>, transform_indices = @transform_2, window_bounds = array<i64: 64, 128>}, {transform_indices = @transform_3, window_bounds = array<i64: 8, 128>}]} {
    %c0 = arith.constant 0 : index
    %c0_0 = arith.constant 0 : index
    %0 = vector.load %arg1[%c0, %c0_0] : memref<8x8xi32, #tpu.memory_space<vmem>>, vector<8x8xi32>
    %1 = arith.sitofp %0 : vector<8x8xi32> to vector<8x8xf32>
    %c0_1 = arith.constant 0 : index
    %c0_2 = arith.constant 0 : index
    %2 = vector.load %arg2[%c0_1, %c0_2] : memref<8x64xf32, #tpu.memory_space<vmem>>, vector<8x64xf32>
    %cst = arith.constant dense<0.000000e+00> : vector<8x64xf32>
    %3 = tpu.matmul %1, %2, %cst {dimension_numbers = #tpu.dot_dimension_numbers<[1], [0], [0], [1], [0, 0, 1, 1], [], []>, precision = #tpu.contract_precision<fp32>} : vector<8x8xf32>, vector<8x64xf32>, vector<8x64xf32> -> vector<8x64xf32>
    %4 = tpu.iota {dimensions = array<i32: 1>} : vector<8x64xi32>
    %c8_i32 = arith.constant 8 : i32
    %c0_i32 = arith.constant 0 : i32
    %5 = arith.cmpi eq, %c8_i32, %c0_i32 : i32
    %c1_i32 = arith.constant 1 : i32
    %6 = arith.select %5, %c1_i32, %c8_i32 : i32
    %7 = vector.broadcast %6 : i32 to vector<8x64xi32>
    %8 = arith.remsi %4, %7 : vector<8x64xi32>
    %c0_i32_3 = arith.constant 0 : i32
    %9 = vector.broadcast %c0_i32_3 : i32 to vector<8x64xi32>
    %10 = arith.cmpi ne, %8, %9 : vector<8x64xi32>
    %c0_i32_4 = arith.constant 0 : i32
    %11 = vector.broadcast %c0_i32_4 : i32 to vector<8x64xi32>
    %12 = arith.cmpi slt, %8, %11 : vector<8x64xi32>
    %c0_i32_5 = arith.constant 0 : i32
    %13 = arith.cmpi slt, %6, %c0_i32_5 : i32
    %14 = vector.broadcast %13 : i1 to vector<8x64xi1>
    %15 = vector.broadcast %14 : vector<8x64xi1> to vector<8x64xi1>
    %16 = arith.xori %12, %15 : vector<8x64xi1>
    %17 = arith.andi %16, %10 : vector<8x64xi1>
    %18 = vector.broadcast %6 : i32 to vector<8x64xi32>
    %19 = arith.addi %8, %18 : vector<8x64xi32>
    %20 = arith.select %17, %19, %8 : vector<8x64xi1>, vector<8x64xi32>
    %21 = arith.sitofp %20 : vector<8x64xi32> to vector<8x64xf32>
    %22 = arith.cmpf oeq, %3, %21 : vector<8x64xf32>
    %23 = arith.extui %22 : vector<8x64xi1> to vector<8x64xi32>
    %24 = arith.sitofp %23 : vector<8x64xi32> to vector<8x64xf32>
    %c0_6 = arith.constant 0 : index
    %c0_7 = arith.constant 0 : index
    %25 = vector.load %arg3[%c0_6, %c0_7] : memref<64x128xf32, #tpu.memory_space<vmem>>, vector<64x128xf32>
    %cst_8 = arith.constant dense<0.000000e+00> : vector<8x128xf32>
    %26 = tpu.matmul %24, %25, %cst_8 {dimension_numbers = #tpu.dot_dimension_numbers<[1], [0], [0], [1], [0, 0, 1, 1], [], []>, precision = #tpu.contract_precision<fp32>} : vector<8x64xf32>, vector<64x128xf32>, vector<8x128xf32> -> vector<8x128xf32>
    %c0_9 = arith.constant 0 : index
    %c0_10 = arith.constant 0 : index
    %27 = vector.load %arg4[%c0_9, %c0_10] : memref<8x128xf32, #tpu.memory_space<vmem>>, vector<8x128xf32>
    tpu.vector_store %arg4[%c0_9, %c0_10], %26 {strides = array<i32>} : memref<8x128xf32, #tpu.memory_space<vmem>>, vector<8x128xf32>,
    return
  }
  func.func @transform_0(%arg0: i32) -> (i32, i32) {
    %c0_i32 = arith.constant 0 : i32
    %c0_i32_0 = arith.constant 0 : i32
    return %arg0, %c0_i32 : i32, i32
  }
  func.func @transform_1(%arg0: i32) -> (i32, i32) {
    %c0_i32 = arith.constant 0 : i32
    %c0_i32_0 = arith.constant 0 : i32
    %c0_i32_1 = arith.constant 0 : i32
    return %c0_i32, %c0_i32_0 : i32, i32
  }
  func.func @transform_2(%arg0: i32) -> (i32, i32) {
    %c0_i32 = arith.constant 0 : i32
    %c0_i32_0 = arith.constant 0 : i32
    %c0_i32_1 = arith.constant 0 : i32
    return %c0_i32, %c0_i32_0 : i32, i32
  }
  func.func @transform_3(%arg0: i32) -> (i32, i32) {
    %c0_i32 = arith.constant 0 : i32
    %c0_i32_0 = arith.constant 0 : i32
    return %arg0, %c0_i32 : i32, i32
  }
}

</mosaic_0001>

<bundles_post_ra>
// kernel: tpu_custom_call.1
= control target key start
LH: loop header
LB: loop body
LE: loop exit
PB: predicated region body
PF: predicated region fallthrough
CT: control target
= control target key end

     0   :  { %8 = vsyncpa [#allocation3], 0  ;;  %s709_s0 = inlined_call_operand.hbm [shape: s32[8,8], index: 0, kind: input, shape index: {}]   ;;  %s710_s1 = inlined_call_operand.hbm [shape: f32[8,64], index: 1, kind: input, shape index: {}]   ;;  %s711_s2 = inlined_call_operand.hbm [shape: f32[64,128], index: 2, kind: input, shape index: {}]   ;;  %s712_s3 = inlined_call_operand.hbm [shape: f32[8,128], index: 3, kind: output, shape index: {}]  }
   0x1   :  { %9 = vsyncpa [#allocation6], 0  ;;  %s27_s14 = sshll.u32 %s710_s1, 4  ;;  %s28_s14 = int_to_ptr.hbm [resolvable:$true] %s27_s14 }
   0x2   :  { %10 = vsyncpa [#allocation4], 0  ;;  %s610_s15 = smov [#allocation5]   ;;  %s16_s19 = sshll.u32 %s709_s0, 4  ;;  %s17_s19 = int_to_ptr.hbm [resolvable:$true] %s16_s19 }
   0x3   :  { %s29_s16 = sshll.u32 %s610_s15, 4  ;;  %s611_s20 = smov [#allocation2]   ;;  %s30_s16 = int_to_ptr.vmem [resolvable:$true] %s29_s16 }
   0x4   :  { %32 = dma.hbm_to_vmem [thread:$0]  %s28_s14, 128, %s30_s16, [#allocation6]  }
   0x5   :  { %s18_s21 = sshll.u32 %s611_s20, 4  ;;  %s37_s24 = sshll.u32 %s711_s2, 4  ;;  %s19_s21 = int_to_ptr.vmem [resolvable:$true] %s18_s21  ;;  %s38_s24 = int_to_ptr.hbm [resolvable:$true] %s37_s24 }
   0x6   :  { %21 = dma.hbm_to_vmem [thread:$0]  %s17_s19, 128, %s19_s21, [#allocation3]  }
   0x7   :  { %s612_s1 = smov [#allocation7]   ;;  %s613_s26 = smov 128  }
   0x8   :  { %s39_s25 = sshll.u32 %s612_s1, 4  ;;  %s614_s27 = smov 8   ;;  %s40_s25 = int_to_ptr.vmem [resolvable:$true] %s39_s25 }
   0x9   :  { %45 = dma.hbm_to_vmem [thread:$0]  %s38_s24, 1024, %s40_s25, [#allocation6], %s613_s26, %s613_s26, %s614_s27  }
   0xa   :  { %604 = dma.done.wait [#allocation3], 128  }
   0xb   :  { %605 = vsyncadd [#allocation3], 4294967168 }
   0xc   :  { %606 = dma.done.wait [#allocation6], 1152  }
   0xd   :  { %607 = vsyncadd [#allocation6], 4294966144  ;;  %v60_v0 = vld [vmem:[#allocation5] sm:$0xff]  ;;  %v58_v1 = vld [vmem:[#allocation2] sm:$0xff]  ;;  %vm61_vm0 = vcmask 64512   ;;  %v211_v62 = vlaneseq  ;;  %vm237_vm1 = vcmask 523264  }
   0xe   :  { %v236_v2 = vld [vmem:[#allocation7 + $0x38] sm:$0xff]  ;;  %v80_v3 = vand.u32 4294901760, %v60_v0  ;;  %v59_v4 = vcvt.s32.f32 %v58_v1  ;;  %v235_v6 = vld [vmem:[#allocation7 + $0x30] sm:$0xff]  ;;  %v234_v7 = vld [vmem:[#allocation7 + $0x28] sm:$0xff]  ;;  %s616_s0 = smov [#allocation8]   ;;  %s486_s30 = sshll.u32 %s712_s3, 4  ;;  %s487_s30 = int_to_ptr.hbm [resolvable:$true] %s486_s30 }
   0xf   :  { %v646_v5 = vand.u32 4294901760, %v236_v2  ;;  %v233_v8 = vld [vmem:[#allocation7 + $0x20] sm:$0xff]  ;;  %v648_v9 = vand.u32 4294901760, %v235_v6  ;;  %v650_v10 = vand.u32 4294901760, %v234_v7  ;;  %v232_v38 = vld [vmem:[#allocation7 + $0x18] sm:$0xff]  ;;  %v231_v40 = vld [vmem:[#allocation7 + $0x10] sm:$0xff] }
  0x10   :  { %v652_v11 = vand.u32 4294901760, %v233_v8  ;;  %v107_v12 = vsub.f32 %v60_v0, %v80_v3  ;;  %v63_v13 = vsel %vm61_vm0, %v59_v4, 0  ;;  %157 = vmatpush.msra.mxu3 %v80_v3  ;;  %81 = vmatpush.msra.mxu0 %v80_v3  ;;  %v257_v39 = vand.u32 4294901760, %v232_v38  ;;  %v230_v43 = vld [vmem:[#allocation7 + $0x8] sm:$0xff]  ;;  %v229_v47 = vld [vmem:[#allocation7] sm:$0xff]  ;;  %s484_s2 = sshll.u32 %s616_s0, 4  ;;  %s485_s2 = int_to_ptr.vmem [resolvable:$true] %s484_s2 }
  0x11   :  { %v655_v14 = vsub.f32 %v236_v2, %v646_v5  ;;  %v82_v15 = vand.u32 4294901760, %v63_v13  ;;  %v658_v16 = vsub.f32 %v235_v6, %v648_v9  ;;  %v661_v17 = vsub.f32 %v234_v7, %v650_v10 }
  0x12   :  { %v664_v18 = vsub.f32 %v233_v8, %v652_v11  ;;  %134 = vmatpush.msra.mxu2 %v107_v12  ;;  %v108_v19 = vand.u32 4294901760, %v107_v12  ;;  %v307_v41 = vsub.f32 %v232_v38, %v257_v39  ;;  %v259_v42 = vand.u32 4294901760, %v231_v40 }
  0x13   :  { %v284_v20 = vand.u32 4294901760, %v655_v14  ;;  %v83_v21 = vsub.f32 %v63_v13, %v82_v15  ;;  %v290_v22 = vand.u32 4294901760, %v658_v16  ;;  %v296_v23 = vand.u32 4294901760, %v661_v17 }
  0x14   :  { %v302_v24 = vand.u32 4294901760, %v664_v18  ;;  %250 = vmatpush.msrb.mxu2 %v646_v5  ;;  %v109_v25 = vsub.f32 %v107_v12, %v108_v19  ;;  %183 = vmatpush.msrb.mxu0 %v108_v19  ;;  %v308_v44 = vand.u32 4294901760, %v307_v41  ;;  %v313_v45 = vsub.f32 %v231_v40, %v259_v42 }
  0x15   :  { %v285_v26 = vsub.f32 %v655_v14, %v284_v20  ;;  %137 = vmatmul.f32.vlgmr.msra.gmra.mxu2 %v83_v21  ;;  %v84_v27 = vand.u32 4294901760, %v83_v21  ;;  %v291_v28 = vsub.f32 %v658_v16, %v290_v22  ;;  %v297_v29 = vsub.f32 %v661_v17, %v296_v23 }
  0x16   :  { %v110_v30 = vand.u32 4294901760, %v109_v25  ;;  %v303_v32 = vsub.f32 %v664_v18, %v302_v24  ;;  %252 = vmatpush.msrb.mxu2 %v648_v9  ;;  %v261_v46 = vand.u32 4294901760, %v230_v43  ;;  %v309_v48 = vsub.f32 %v307_v41, %v308_v44 }
  0x17   :  { %v286_v31 = vand.u32 4294901760, %v285_v26  ;;  %161 = vmatmul.f32.vlgmr.msra.gmra.mxu3 %v84_v27  ;;  %v85_v33 = vsub.f32 %v83_v21, %v84_v27  ;;  %v292_v34 = vand.u32 4294901760, %v291_v28  ;;  %v298_v35 = vand.u32 4294901760, %v297_v29 }
  0x18   :  { %111 = vmatpush.msra.mxu1 %v110_v30  ;;  %254 = vmatpush.msrb.mxu2 %v650_v10  ;;  %v304_v37 = vand.u32 4294901760, %v303_v32  ;;  %v314_v49 = vand.u32 4294901760, %v313_v45  ;;  %v319_v50 = vsub.f32 %v230_v43, %v261_v46  ;;  %v263_v51 = vand.u32 4294901760, %v229_v47 }
  0x19   :  { %287 = vmatpush.msrb.mxu3 %v286_v31  ;;  %v86_v36 = vand.u32 4294901760, %v85_v33  ;;  %113 = vmatmul.f32.vlgmr.msra.gmra.mxu1 %v82_v15  ;;  %v310_v52 = vand.u32 4294901760, %v309_v48  ;;  %v615_v13 = vmov 0.0  }
  0x1a   :  { %205 = vmatpush.msrb.mxu1 %v80_v3  ;;  %256 = vmatpush.msrb.mxu2 %v652_v11  ;;  %v315_v53 = vsub.f32 %v313_v45, %v314_v49  ;;  %v320_v54 = vand.u32 4294901760, %v319_v50  ;;  %v325_v55 = vsub.f32 %v229_v47, %v263_v51  ;;  %v212_v3 = vand.u32 127, %v211_v62 }
  0x1b   :  { %293 = vmatpush.msrb.mxu3 %v292_v34  ;;  %87 = vmatmul.f32.vlgmr.msra.gmra.mxu0 %v86_v36 }
  0x1c   :  { %382 = vmatpush.msra.mxu1 %v646_v5  ;;  %345 = vmatpush.msra.mxu0 %v655_v14  ;;  %v316_v56 = vand.u32 4294901760, %v315_v53  ;;  %v321_v57 = vsub.f32 %v319_v50, %v320_v54  ;;  %v326_v58 = vand.u32 4294901760, %v325_v55  ;;  %v217_v6 = vand.u32 7, %v212_v3 }
  0x1d   :  { %299 = vmatpush.msrb.mxu3 %v298_v35  ;;  %258 = vmatpush.msrb.mxu2 %v257_v39 }
  0x1e   :  { %384 = vmatpush.msra.mxu1 %v648_v9  ;;  %348 = vmatpush.msra.mxu0 %v658_v16  ;;  %v322_v59 = vand.u32 4294901760, %v321_v57  ;;  %v327_v60 = vsub.f32 %v325_v55, %v326_v58  ;;  %v225_v12 = vcvt.s32.f32 %v217_v6 }
  0x1f   :  { %305 = vmatpush.msrb.mxu3 %v304_v37  ;;  %260 = vmatpush.msrb.mxu2 %v259_v42 }
  0x20   :  { %386 = vmatpush.msra.mxu1 %v650_v10  ;;  %351 = vmatpush.msra.mxu0 %v661_v17  ;;  %v328_v61 = vand.u32 4294901760, %v327_v60 }
  0x21   :  { %207 = vmatmul.f32.vlgmr.msrb.gmra.mxu1 %v82_v15  ;;  %262 = vmatpush.msrb.mxu2 %v261_v46 }
  0x22   :  { %354 = vmatpush.msra.mxu0 %v664_v18  ;;  %388 = vmatpush.msra.mxu1 %v652_v11 }
  0x23   :  { %185 = vmatmul.f32.vlgmr.msrb.gmra.mxu0 %v82_v15  ;;  %264 = vmatpush.msrb.mxu2 %v263_v51 }
  0x24   :  { %390 = vmatpush.msra.mxu1 %v257_v39  ;;  %357 = vmatpush.msra.mxu0 %v307_v41 }
  0x25   :  { %415 = vmatpush.msra.mxu2 %v284_v20  ;;  %311 = vmatpush.msrb.mxu3 %v310_v52 }
  0x26   :  { %392 = vmatpush.msra.mxu1 %v259_v42  ;;  %360 = vmatpush.msra.mxu0 %v313_v45 }
  0x27   :  { %419 = vmatpush.msra.mxu2 %v290_v22  ;;  %317 = vmatpush.msrb.mxu3 %v316_v56 }
  0x28   :  { %394 = vmatpush.msra.mxu1 %v261_v46  ;;  %363 = vmatpush.msra.mxu0 %v319_v50 }
  0x29   :  { %423 = vmatpush.msra.mxu2 %v296_v23  ;;  %323 = vmatpush.msrb.mxu3 %v322_v59 }
  0x2a   :  { %396 = vmatpush.msra.mxu1 %v263_v51  ;;  %366 = vmatpush.msra.mxu0 %v325_v55 }
  0x2b   :  { %427 = vmatpush.msra.mxu2 %v302_v24  ;;  %329 = vmatpush.msrb.mxu3 %v328_v61 }
  0x2d   :  { %458 = vmatpush.msra.mxu3 %v646_v5  ;;  %431 = vmatpush.msra.mxu2 %v308_v44 }
  0x2f   :  { %460 = vmatpush.msra.mxu3 %v648_v9  ;;  %435 = vmatpush.msra.mxu2 %v314_v49 }
  0x31   :  { %462 = vmatpush.msra.mxu3 %v650_v10  ;;  %439 = vmatpush.msra.mxu2 %v320_v54 }
  0x33   :  { %464 = vmatpush.msra.mxu3 %v652_v11  ;;  %443 = vmatpush.msra.mxu2 %v326_v58 }
  0x35   :  { %466 = vmatpush.msra.mxu3 %v257_v39 }
  0x37   :  { %468 = vmatpush.msra.mxu3 %v259_v42 }
  0x39   :  { %470 = vmatpush.msra.mxu3 %v261_v46 }
  0x3b   :  { %472 = vmatpush.msra.mxu3 %v263_v51 }
  0x96   :  { %v114_v63 = vpop.f32.mrf.mxu1 }
  0x98   :  { %v88_v0 = vpop.f32.mrf.mxu0  ;;  %v138_v1 = vpop.f32.mrf.mxu2 }
  0x99   :  { %v115_v2 = vadd.f32 %v114_v63, %v88_v0 }
  0x9a   :  { %v162_v5 = vpop.f32.mrf.mxu3 }
  0x9b   :  { %v139_v4 = vadd.f32 %v138_v1, %v115_v2 }
  0x9d   :  { %v163_v7 = vadd.f32 %v162_v5, %v139_v4 }
  0x9e   :  { %v208_v9 = vpop.f32.mrf.mxu1 }
  0xa0   :  { %v186_v8 = vpop.f32.mrf.mxu0 }
  0xa1   :  { %v187_v10 = vadd.f32 %v186_v8, %v163_v7 }
  0xa3   :  { %v209_v11 = vadd.f32 %v208_v9, %v187_v10 }
  0xa5   :  { %vm226_vm2 = vcmp.eq.f32.partialorder %v209_v11, %v225_v12 }
  0xa6   :  { %v497_v14 = vsel %vm226_vm2, 1.0, %v615_v13 }
  0xa7   :  { %v239_v15 = vsel %vm237_vm1, %v497_v14, 0  ;;  %498 = vmatmul.msk.f32.vlgmr.msrb.gmra.mxu3 %vm237_vm1, %v497_v14 }
  0xa8   :  { %v266_v16 = vsub.f32 %v239_v15, %v239_v15 }
  0xaa   :  { %369 = vmatmul.f32.vlgmr.msra.gmra.mxu0 %v266_v16  ;;  %v267_v17 = vand.u32 4294901760, %v266_v16 }
  0xac   :  { %400 = vmatmul.f32.vlgmr.msra.gmra.mxu1 %v267_v17  ;;  %v268_v18 = vsub.f32 %v266_v16, %v267_v17 }
  0xae   :  { %v269_v19 = vand.u32 4294901760, %v268_v18 }
  0xaf   :  { %500 = vmatmul.msk.f32.vlgmr.msra.gmra.mxu3 %vm237_vm1, %v497_v14 }
  0xb0   :  { %270 = vmatmul.f32.vlgmr.msrb.gmra.mxu2 %v269_v19 }
  0xb8   :  { %499 = vmatmul.msk.f32.vlgmr.msra.gmra.mxu2 %vm237_vm1, %v497_v14 }
 0x127   :  { %v370_v23 = vpop.f32.mrf.mxu0 }
 0x129   :  { %v401_v25 = vpop.f32.mrf.mxu1 }
 0x12a   :  { %v332_v20 = vpop.f32.mrf.mxu3 }
 0x132   :  { %v475_v29 = vpop.f32.mrf.mxu3 }
 0x133   :  { %v271_v21 = vpop.f32.mrf.mxu2 }
 0x134   :  { %v333_v22 = vadd.f32 %v332_v20, %v271_v21 }
 0x136   :  { %v371_v24 = vadd.f32 %v370_v23, %v333_v22 }
 0x138   :  { %v402_v26 = vadd.f32 %v401_v25, %v371_v24 }
 0x13b   :  { %v446_v27 = vpop.f32.mrf.mxu2 }
 0x13c   :  { %v447_v28 = vadd.f32 %v446_v27, %v402_v26 }
 0x13e   :  { %v476_v30 = vadd.f32 %v475_v29, %v447_v28 }
 0x140   :  { %478 = vst [vmem:[#allocation8] sm:$0xff] %v476_v30 }
 0x141   :  { %489 = dma.vmem_to_hbm [thread:$0]  %s485_s2, 128, %s487_s30, [#allocation4]  }
 0x142   :  { %608 = dma.done.wait [#allocation4], 128  }
 0x143   :  { %609 = vsyncadd [#allocation4], 4294967168 }
 0x144   :  { %494 = vsyncpa [#allocation3], 1 }
 0x145   :  { %495 = vsyncpa [#allocation6], 1 }
 0x146   :  { %496 = vsyncpa [#allocation4], 1 }

</bundles_post_ra>
